<compile_context>
chip_gen: v7x
topology: tpu7x:2x2x1
jax: 0.10.0
libtpu: 0.0.40
codegen_flags: <defaults>
</compile_context>

<pallas_src>
import functools

import jax
import jax.numpy as jnp
from jax.experimental import pallas as pl
from jax.experimental.pallas import tpu as pltpu


# ---------------------------------------------------------------------------
# Kernel: one M-row tile of the MLP.  x (M, S_pad) f32 -> tanh(fc3) (M, H) f32.
# ---------------------------------------------------------------------------
def _actor_mlp_kernel(x_ref, w_ref, b_ref, out_ref, *, S_pad, H):
    x = x_ref[...]                                   # (M, S_pad) f32

    # Static slices of the packed parameter slabs (zero-cost ref views; all
    # starts/extents are multiples of 8 -> sublane-aligned).
    w1 = w_ref[0:S_pad, :]                           # (S_pad, H) bf16, rows >= S are zero
    w2 = w_ref[S_pad:S_pad + H, :]                   # (H, H)     bf16
    w3 = w_ref[S_pad + H:S_pad + 2 * H, :]           # (H, H)     bf16, cols >= A are zero
    b1 = b_ref[0:1, :]                               # (1, H)     f32
    b2 = b_ref[1:2, :]
    b3 = b_ref[2:3, :]                               # cols >= A are zero

    bf16 = jnp.bfloat16

    # linear1 + relu   (bf16 MXU operands, f32 accumulation, f32 VPU math)
    h1 = jnp.dot(x.astype(bf16), w1, preferred_element_type=jnp.float32) + b1
    h1 = jnp.maximum(h1, 0.0)

    # linear2 + relu
    h2 = jnp.dot(h1.astype(bf16), w2, preferred_element_type=jnp.float32) + b2
    h2 = jnp.maximum(h2, 0.0)

    # linear3 + tanh, stored lane-dense (M, 128); the [:, :A] slice happens in
    # the wrapper (padded w3/b3 columns are zero -> dead after the slice).
    y3 = jnp.dot(h2.astype(bf16), w3, preferred_element_type=jnp.float32) + b3
    out_ref[...] = jnp.tanh(y3)


# ---------------------------------------------------------------------------
# Host-side (one-time) parameter packing.
# ---------------------------------------------------------------------------
def pack_params(params, *, weight_dtype=jnp.bfloat16):
    """Weights -> one bf16 slab (w1-padded | w2 | w3-col-padded); biases -> one f32 (8, H) slab."""
    w1, b1, w2, b2, w3, b3 = params          # w: (in, out), b: (1, out)
    S, H = w1.shape
    A = w3.shape[1]
    S_pad = ((S + 7) // 8) * 8               # 8-row (sublane) alignment

    w1p = jnp.zeros((S_pad, H), jnp.float32).at[:S, :].set(w1)
    w3p = jnp.zeros((H, H), jnp.float32).at[:, :A].set(w3)
    w_pack = jnp.concatenate([w1p, w2, w3p], axis=0).astype(weight_dtype)   # (S_pad+2H, H)

    b3p = jnp.zeros((1, H), jnp.float32).at[:, :A].set(b3)
    b_pack = jnp.zeros((8, H), jnp.float32)                                 # full (8,128) tile
    b_pack = b_pack.at[0:1, :].set(b1).at[1:2, :].set(b2).at[2:3, :].set(b3p)

    return {"w": w_pack, "b": b_pack, "S": S, "S_pad": S_pad, "H": H, "A": A}


# ---------------------------------------------------------------------------
# Batched MLP application: rows (R, S) -> tanh(MLP(rows)) (R, A).
# ---------------------------------------------------------------------------
def actor_mlp(rows, packed, *, m_tile=256):
    w_pack, b_pack = packed["w"], packed["b"]
    S, S_pad, H, A = packed["S"], packed["S_pad"], packed["H"], packed["A"]

    R = rows.shape[0]
    assert rows.shape[1] == S

    # Tile size: multiple of 8, no larger than needed for tiny batches.
    m_tile_eff = min(m_tile, max(8, ((R + 7) // 8) * 8))
    num_tiles = pl.cdiv(R, m_tile_eff)
    R_pad = num_tiles * m_tile_eff

    # Zero-pad rows (dead, sliced off below) and columns (hit zero w1 rows).
    x = jnp.zeros((R_pad, S_pad), jnp.float32).at[:R, :S].set(rows.astype(jnp.float32))

    kernel = functools.partial(_actor_mlp_kernel, S_pad=S_pad, H=H)

    out = pl.pallas_call(
        kernel,
        out_shape=jax.ShapeDtypeStruct((R_pad, H), jnp.float32),
        grid=(num_tiles,),
        in_specs=[
            pl.BlockSpec((m_tile_eff, S_pad), lambda i: (i, 0)),   # per-step state tile
            pl.BlockSpec(w_pack.shape, lambda i: (0, 0)),          # VMEM-resident weights
            pl.BlockSpec(b_pack.shape, lambda i: (0, 0)),          # VMEM-resident biases
        ],
        out_specs=pl.BlockSpec((m_tile_eff, H), lambda i: (i, 0)), # lane-dense (M, 128) store
        compiler_params=pltpu.CompilerParams(
            dimension_semantics=("parallel",)),                    # v7x: split across 2 TCs
    )(x, w_pack, b_pack)

    return out[:R, :A]


# ---------------------------------------------------------------------------
# Module-faithful forward and an amortized batched variant.
# ---------------------------------------------------------------------------
def actor_forward(state, packed, *, m_tile=256):
    """PyTorch Actor.forward semantics: state (B>=2, S) -> (lin (1, A), ang (1, A)).

    Only output rows 0 and 1 reach the heads (output[0]/output[1] in the
    original module), so only those two state rows are shipped to the kernel.
    """
    B = state.shape[0]
    assert B >= 2, "Actor.forward reads output rows 0 and 1 -> batch must be >= 2"
    out = actor_mlp(state[:2], packed, m_tile=m_tile)          # (2, A)
    lin_out = (out[0:1, :] + 1.0) / 20.0
    ang_out = out[1:2, :] / 2.0
    return lin_out, ang_out


def actor_forward_batch(states, packed, *, m_tile=256):
    """Amortized path: states (N, >=2, S) -> (lin (N, A), ang (N, A)).

    All N forwards share ONE pallas_call; the weight slab is DMA'd once and
    stays VMEM-resident across all grid steps.
    """
    N, b, S = states.shape
    assert b >= 2
    rows = states[:, :2, :].reshape(N * 2, S)
    out = actor_mlp(rows, packed, m_tile=m_tile).reshape(N, 2, -1)
    lin = (out[:, 0, :] + 1.0) / 20.0
    ang = out[:, 1, :] / 2.0
    return lin, ang


# ---------------------------------------------------------------------------
# Init + pure-JAX references.
# ---------------------------------------------------------------------------
def init_params(key, state_size, action_size, hidden=128):
    """Deterministic init mimicking nn.Linear's U(-1/sqrt(fan_in), 1/sqrt(fan_in))."""
    ks = jax.random.split(key, 6)

    def linear(kw, kb, fan_in, fan_out):
        bound = 1.0 / jnp.sqrt(fan_in)
        w = jax.random.uniform(kw, (fan_in, fan_out), jnp.float32, -bound, bound)
        b = jax.random.uniform(kb, (1, fan_out), jnp.float32, -bound, bound)
        return w, b

    w1, b1 = linear(ks[0], ks[1], state_size, hidden)
    w2, b2 = linear(ks[2], ks[3], hidden, hidden)
    w3, b3 = linear(ks[4], ks[5], hidden, action_size)
    return (w1, b1, w2, b2, w3, b3)


def _mlp_ref_bf16(x, params):
    """bf16-matmul-operand / f32-accumulation reference (mirrors kernel numerics)."""
    w1, b1, w2, b2, w3, b3 = params
    bf = lambda a: a.astype(jnp.bfloat16)
    dot = lambda a, b: jnp.dot(bf(a), bf(b), preferred_element_type=jnp.float32)
    h1 = jax.nn.relu(dot(x, w1) + b1)
    h2 = jax.nn.relu(dot(h1, w2) + b2)
    return jnp.tanh(dot(h2, w3) + b3)


def actor_ref_bf16(state, params):
    out = _mlp_ref_bf16(state, params)
    return ((out[0] + 1.0) / 20.0)[None, :], (out[1] / 2.0)[None, :]


def actor_ref_f32(state, params):
    """Full-f32 reference of the original PyTorch module."""
    w1, b1, w2, b2, w3, b3 = params
    h1 = jax.nn.relu(state @ w1 + b1)
    h2 = jax.nn.relu(h1 @ w2 + b2)
    out = jnp.tanh(h2 @ w3 + b3)
    return ((out[0] + 1.0) / 20.0)[None, :], (out[1] / 2.0)[None, :]


if __name__ == "__main__":
    key = jax.random.PRNGKey(0)
    k_state, k_params, k_batch = jax.random.split(key, 3)

    state_size = 16
    action_size = 8
    batch = 2  # forward indexes output[0] and output[1], so batch must be >= 2

    params = init_params(k_params, state_size, action_size)
    packed = pack_params(params)

    # --- single forward (module semantics) -----------------------------------
    state = jax.random.normal(k_state, (batch, state_size), jnp.float32)
    lin_out, ang_out = actor_forward(state, packed)
    jax.block_until_ready((lin_out, ang_out))
    assert lin_out.shape == (1, action_size) and ang_out.shape == (1, action_size)

    # Tight check: same numerics (bf16 matmul operands, f32 accumulation) via XLA.
    lin_k, ang_k = actor_ref_bf16(state, params)
    assert jnp.allclose(lin_out, lin_k, atol=1e-5, rtol=1e-5)
    assert jnp.allclose(ang_out, ang_k, atol=1e-5, rtol=1e-5)

    # Semantic check vs. the original full-f32 module math (looser: bf16 weights).
    lin_f, ang_f = actor_ref_f32(state, params)
    assert jnp.allclose(lin_out, lin_f, atol=3e-2)
    assert jnp.allclose(ang_out, ang_f, atol=3e-2)

    # --- batched / amortized path (exercises multiple grid steps) ------------
    n_forwards = 200                                   # 400 MLP rows -> 2 grid steps of 256
    states = jax.random.normal(k_batch, (n_forwards, 2, state_size), jnp.float32)
    lin_b, ang_b = actor_forward_batch(states, packed)
    jax.block_until_ready((lin_b, ang_b))
    assert lin_b.shape == (n_forwards, action_size)
    assert ang_b.shape == (n_forwards, action_size)

    rows = states.reshape(n_forwards * 2, state_size)
    out_r = _mlp_ref_bf16(rows, params)                # (2N, A_full->A after slice below)
    lin_r = (out_r[0::2, :action_size] + 1.0) / 20.0
    ang_r = out_r[1::2, :action_size] / 2.0
    assert jnp.allclose(lin_b, lin_r, atol=1e-5, rtol=1e-5)
    assert jnp.allclose(ang_b, ang_r, atol=1e-5, rtol=1e-5)

    print("KERNEL_OK")
</pallas_src>

<mosaic_0001>
module attributes {stable_mosaic.version = 11 : i64} {
  func.func @_actor_mlp_kernel(%arg0: i32, %arg1: memref<8x16xf32, #tpu.memory_space<vmem>>, %arg2: memref<272x128xbf16, #tpu.memory_space<vmem>>, %arg3: memref<8x128xf32, #tpu.memory_space<vmem>>, %arg4: memref<8x128xf32, #tpu.memory_space<vmem>>) attributes {dimension_semantics = [#tpu.dimension_semantics<parallel>], iteration_bounds = array<i64: 1>, scalar_prefetch = 0 : i64, scratch_operands = 0 : i64, tpu.core_type = #tpu.core_type<tc>, window_params = [{transform_indices = @transform_0, window_bounds = array<i64: 8, 16>}, {pipeline_mode = #tpu.pipeline_mode<synchronous>, transform_indices = @transform_1, window_bounds = array<i64: 272, 128>}, {pipeline_mode = #tpu.pipeline_mode<synchronous>, transform_indices = @transform_2, window_bounds = array<i64: 8, 128>}, {transform_indices = @transform_3, window_bounds = array<i64: 8, 128>}]} {
    %c0 = arith.constant 0 : index
    %c0_0 = arith.constant 0 : index
    %0 = vector.load %arg1[%c0, %c0_0] : memref<8x16xf32, #tpu.memory_space<vmem>>, vector<8x16xf32>
    %c0_1 = arith.constant 0 : index
    %c0_2 = arith.constant 0 : index
    %1 = vector.load %arg2[%c0_1, %c0_2] : memref<272x128xbf16, #tpu.memory_space<vmem>>, vector<16x128xbf16>
    %c16 = arith.constant 16 : index
    %c0_3 = arith.constant 0 : index
    %2 = vector.load %arg2[%c16, %c0_3] : memref<272x128xbf16, #tpu.memory_space<vmem>>, vector<128x128xbf16>
    %c144 = arith.constant 144 : index
    %c0_4 = arith.constant 0 : index
    %3 = vector.load %arg2[%c144, %c0_4] : memref<272x128xbf16, #tpu.memory_space<vmem>>, vector<128x128xbf16>
    %c0_5 = arith.constant 0 : index
    %c0_6 = arith.constant 0 : index
    %4 = vector.load %arg3[%c0_5, %c0_6] : memref<8x128xf32, #tpu.memory_space<vmem>>, vector<1x128xf32>
    %c1 = arith.constant 1 : index
    %c0_7 = arith.constant 0 : index
    %5 = vector.load %arg3[%c1, %c0_7] : memref<8x128xf32, #tpu.memory_space<vmem>>, vector<1x128xf32>
    %c2 = arith.constant 2 : index
    %c0_8 = arith.constant 0 : index
    %6 = vector.load %arg3[%c2, %c0_8] : memref<8x128xf32, #tpu.memory_space<vmem>>, vector<1x128xf32>
    %7 = arith.truncf %0 : vector<8x16xf32> to vector<8x16xbf16>
    %cst = arith.constant dense<0.000000e+00> : vector<8x128xf32>
    %8 = tpu.matmul %7, %1, %cst {dimension_numbers = #tpu.dot_dimension_numbers<[1], [0], [0], [1], [0, 0, 1, 1], [], []>} : vector<8x16xbf16>, vector<16x128xbf16>, vector<8x128xf32> -> vector<8x128xf32>
    %9 = vector.broadcast %4 : vector<1x128xf32> to vector<8x128xf32>
    %10 = arith.addf %8, %9 : vector<8x128xf32>
    %cst_9 = arith.constant 0.000000e+00 : f32
    %11 = vector.broadcast %cst_9 : f32 to vector<8x128xf32>
    %12 = arith.maximumf %10, %11 : vector<8x128xf32>
    %13 = arith.truncf %12 : vector<8x128xf32> to vector<8x128xbf16>
    %cst_10 = arith.constant dense<0.000000e+00> : vector<8x128xf32>
    %14 = tpu.matmul %13, %2, %cst_10 {dimension_numbers = #tpu.dot_dimension_numbers<[1], [0], [0], [1], [0, 0, 1, 1], [], []>} : vector<8x128xbf16>, vector<128x128xbf16>, vector<8x128xf32> -> vector<8x128xf32>
    %15 = vector.broadcast %5 : vector<1x128xf32> to vector<8x128xf32>
    %16 = arith.addf %14, %15 : vector<8x128xf32>
    %cst_11 = arith.constant 0.000000e+00 : f32
    %17 = vector.broadcast %cst_11 : f32 to vector<8x128xf32>
    %18 = arith.maximumf %16, %17 : vector<8x128xf32>
    %19 = arith.truncf %18 : vector<8x128xf32> to vector<8x128xbf16>
    %cst_12 = arith.constant dense<0.000000e+00> : vector<8x128xf32>
    %20 = tpu.matmul %19, %3, %cst_12 {dimension_numbers = #tpu.dot_dimension_numbers<[1], [0], [0], [1], [0, 0, 1, 1], [], []>} : vector<8x128xbf16>, vector<128x128xbf16>, vector<8x128xf32> -> vector<8x128xf32>
    %21 = vector.broadcast %6 : vector<1x128xf32> to vector<8x128xf32>
    %22 = arith.addf %20, %21 : vector<8x128xf32>
    %23 = math.tanh %22 : vector<8x128xf32>
    %c0_13 = arith.constant 0 : index
    %c0_14 = arith.constant 0 : index
    %24 = vector.load %arg4[%c0_13, %c0_14] : memref<8x128xf32, #tpu.memory_space<vmem>>, vector<8x128xf32>
    tpu.vector_store %arg4[%c0_13, %c0_14], %23 {strides = array<i32>} : memref<8x128xf32, #tpu.memory_space<vmem>>, vector<8x128xf32>,
    return
  }
  func.func @transform_0(%arg0: i32) -> (i32, i32) {
    %c0_i32 = arith.constant 0 : i32
    %c0_i32_0 = arith.constant 0 : i32
    return %arg0, %c0_i32 : i32, i32
  }
  func.func @transform_1(%arg0: i32) -> (i32, i32) {
    %c0_i32 = arith.constant 0 : i32
    %c0_i32_0 = arith.constant 0 : i32
    %c0_i32_1 = arith.constant 0 : i32
    return %c0_i32, %c0_i32_0 : i32, i32
  }
  func.func @transform_2(%arg0: i32) -> (i32, i32) {
    %c0_i32 = arith.constant 0 : i32
    %c0_i32_0 = arith.constant 0 : i32
    %c0_i32_1 = arith.constant 0 : i32
    return %c0_i32, %c0_i32_0 : i32, i32
  }
  func.func @transform_3(%arg0: i32) -> (i32, i32) {
    %c0_i32 = arith.constant 0 : i32
    %c0_i32_0 = arith.constant 0 : i32
    return %arg0, %c0_i32 : i32, i32
  }
}

</mosaic_0001>

<bundles_post_ra>
// kernel: tpu_custom_call.1
= control target key start
LH: loop header
LB: loop body
LE: loop exit
PB: predicated region body
PF: predicated region fallthrough
CT: control target
= control target key end

     0   :  { %8 = vsyncpa [#allocation3], 0  ;;  %s656_s0 = inlined_call_operand.hbm [shape: f32[8,16], index: 0, kind: input, shape index: {}]   ;;  %s657_s1 = inlined_call_operand.hbm [shape: bf16[272,128], index: 1, kind: input, shape index: {}]   ;;  %s658_s2 = inlined_call_operand.hbm [shape: f32[8,128], index: 2, kind: input, shape index: {}]   ;;  %s659_s3 = inlined_call_operand.hbm [shape: f32[8,128], index: 3, kind: output, shape index: {}]  }
   0x1   :  { %9 = vsyncpa [#allocation6], 0 }
   0x2   :  { %10 = vsyncpa [#allocation4], 0  ;;  %s560_s12 = smov [#allocation5]   ;;  %s466_s16 = scalar_lea.hbm %s657_s1, 2176 }
   0x3   :  { %s26_s13 = sshll.u32 %s560_s12, 4  ;;  %p467_p0 = scmp.ne.s32.totalorder %s657_s1, %s466_s16  ;;  %s27_s13 = int_to_ptr.vmem [resolvable:$true] %s26_s13 }
   0x4   :  { %p470_p1 = scmp.lt.u32.totalorder %s466_s16, %s657_s1 }
   0x6   :  { %p472_p2 = pnand %p470_p1, %p467_p0 }
   0x8   :  { %475 = shalt.err (!%p472_p2)
}
   0x9   :  { %s476_s21 = scalar_lea.vmem %s27_s13, 2176  ;;  %p481_p4 = scmp.lt.s32.totalorder %s27_s13, %s27_s13 }
   0xa   :  { %p477_p3 = scmp.ne.s32.totalorder %s27_s13, %s476_s21  ;;  %p482_p5 = scmp.lt.s32.totalorder %s476_s21, %s476_s21 }
   0xc   :  { %p483_p6 = por %p482_p5, %p481_p4 }
   0xe   :  { %p484_p7 = pnand %p483_p6, %p477_p3 }
  0x10   :  { %487 = shalt.err (!%p484_p7)
}
  0x11   :  { %s561_s22 = smov 64   ;;  %s562_s23 = smov 4  }
  0x12   :  { %32 = dma.hbm_to_vmem [thread:$0]  %s657_s1, 2176, %s27_s13, [#allocation6], %s561_s22, %s561_s22, %s562_s23  }
  0x13   :  { %s563_s26 = smov [#allocation2]   ;;  %s564_s28 = smov [#allocation7]  }
  0x14   :  { %s17_s27 = sshll.u32 %s563_s26, 4  ;;  %s39_s29 = sshll.u32 %s564_s28, 4  ;;  %s18_s27 = int_to_ptr.vmem [resolvable:$true] %s17_s27  ;;  %s40_s29 = int_to_ptr.vmem [resolvable:$true] %s39_s29 }
  0x15   :  { %s488_s5 = scalar_lea.hbm %s656_s0, 128 }
  0x16   :  { %p489_p8 = scmp.ne.s32.totalorder %s656_s0, %s488_s5  ;;  %p492_p9 = scmp.lt.u32.totalorder %s488_s5, %s656_s0 }
  0x18   :  { %p494_p10 = pnand %p492_p9, %p489_p8 }
  0x1a   :  { %497 = shalt.err (!%p494_p10)
}
  0x1b   :  { %s498_s1 = scalar_lea.vmem %s18_s27, 128  ;;  %p503_p12 = scmp.lt.s32.totalorder %s18_s27, %s18_s27 }
  0x1c   :  { %p499_p11 = scmp.ne.s32.totalorder %s18_s27, %s498_s1  ;;  %p504_p13 = scmp.lt.s32.totalorder %s498_s1, %s498_s1 }
  0x1e   :  { %p505_p0 = por %p504_p13, %p503_p12 }
  0x20   :  { %p506_p1 = pnand %p505_p0, %p499_p11 }
  0x22   :  { %509 = shalt.err (!%p506_p1)
}
  0x23   :  { %20 = dma.hbm_to_vmem [thread:$0]  %s656_s0, 128, %s18_s27, [#allocation3]  }
  0x24   :  { %s510_s14 = scalar_lea.hbm %s658_s2, 128 }
  0x25   :  { %p511_p2 = scmp.ne.s32.totalorder %s658_s2, %s510_s14  ;;  %p514_p3 = scmp.lt.u32.totalorder %s510_s14, %s658_s2 }
  0x27   :  { %p516_p4 = pnand %p514_p3, %p511_p2 }
  0x29   :  { %519 = shalt.err (!%p516_p4)
}
  0x2a   :  { %s520_s19 = scalar_lea.vmem %s40_s29, 128  ;;  %p525_p6 = scmp.lt.s32.totalorder %s40_s29, %s40_s29 }
  0x2b   :  { %p521_p5 = scmp.ne.s32.totalorder %s40_s29, %s520_s19  ;;  %p526_p7 = scmp.lt.s32.totalorder %s520_s19, %s520_s19 }
  0x2d   :  { %p527_p8 = por %p526_p7, %p525_p6 }
  0x2f   :  { %p528_p9 = pnand %p527_p8, %p521_p5 }
  0x31   :  { %531 = shalt.err (!%p528_p9)
}
  0x32   :  { %42 = dma.hbm_to_vmem [thread:$0]  %s658_s2, 128, %s40_s29, [#allocation6]  }
  0x33   :  { %554 = dma.done.wait [#allocation3], 128  }
  0x34   :  { %555 = vsyncadd [#allocation3], 4294967168 }
  0x35   :  { %556 = dma.done.wait [#allocation6], 2304  }
  0x36   :  { %557 = vsyncadd [#allocation6], 4294964992  ;;  %v565_v0 = vmov 0.0   ;;  %vm566_vm0 = vmmov 0   ;;  %v447_v1 = vld [vmem:[#allocation5] sm:$0xff]   ;;  %v53_v2 = vld [vmem:[#allocation2] sm:$0xff] }
  0x37   :  { %393 = vmatprep.subr.bf16.mxu0 %v565_v0  ;;  %395 = vmatprep.mubr.msk.bf16.mxu0 %vm566_vm0, %v565_v0  ;;  %v91_v3 = vpack.c.bf16 %v53_v2, %v53_v2  ;;  %vm102_vm1 = vcmask 130048   ;;  %v448_v4 = vld [vmem:[#allocation5 + $0x8] sm:$0xff]   ;;  %v449_v5 = vld [vmem:[#allocation5 + $0x10] sm:$0xff]   ;;  %v450_v6 = vld [vmem:[#allocation5 + $0x18] sm:$0xff]   ;;  %s567_s2 = smov [#allocation8]  }
  0x38   :  { %399 = vmatprep.subr.bf16.mxu1 %v565_v0  ;;  %415 = vmatprep.mubr.msk.bf16.mxu1 %vm566_vm0, %v565_v0  ;;  %v451_v7 = vld [vmem:[#allocation5 + $0x20] sm:$0xff]   ;;  %v452_v8 = vld [vmem:[#allocation5 + $0x28] sm:$0xff]   ;;  %v453_v9 = vld [vmem:[#allocation5 + $0x30] sm:$0xff]   ;;  %s342_s21 = sshll.u32 %s567_s2, 4  ;;  %s343_s21 = int_to_ptr.vmem [resolvable:$true] %s342_s21 }
  0x39   :  { %394 = vmatpush3.bf16.msra.mxu0 %v447_v1  ;;  %400 = vmatpush3.bf16.msra.mxu1 %v448_v4  ;;  %v454_v10 = vld [vmem:[#allocation5 + $0x38] sm:$0xff]   ;;  %v455_v11 = vld [vmem:[#allocation5 + $0x40] sm:$0xff]   ;;  %v456_v12 = vld [vmem:[#allocation5 + $0x48] sm:$0xff]   ;;  %s532_s22 = scalar_lea.vmem %s343_s21, 128  ;;  %p537_p11 = scmp.lt.s32.totalorder %s343_s21, %s343_s21 }
  0x3a   :  { %419 = vmatprep.subr.bf16.mxu0 %v565_v0  ;;  %401 = vmatprep.subr.bf16.mxu1 %v565_v0  ;;  %v457_v13 = vld [vmem:[#allocation5 + $0x50] sm:$0xff]   ;;  %v458_v14 = vld [vmem:[#allocation5 + $0x58] sm:$0xff]   ;;  %v459_v15 = vld [vmem:[#allocation5 + $0x60] sm:$0xff]   ;;  %p533_p10 = scmp.ne.s32.totalorder %s343_s21, %s532_s22  ;;  %p538_p12 = scmp.lt.s32.totalorder %s532_s22, %s532_s22 }
  0x3b   :  { %v460_v16 = vld [vmem:[#allocation5 + $0x68] sm:$0xff]   ;;  %v461_v17 = vld [vmem:[#allocation5 + $0x70] sm:$0xff]   ;;  %v462_v26 = vld [vmem:[#allocation5 + $0x78] sm:$0xff]  }
  0x3c   :  { %396 = vmatmul.mubr.msk.bf16.vlgmr.msra.gmra.mrb[0].mxu0 %vm102_vm1, %v91_v3  ;;  %v352_v18 = vld [vmem:[#allocation7] ss:$0 sm:$0xff]  ;;  %v463_v27 = vld [vmem:[#allocation5 + $0x80] sm:$0xff]   ;;  %v355_v28 = vld [vmem:[#allocation7 + $0x1] ss:$0 sm:$0xff]  ;;  %p539_p13 = por %p538_p12, %p537_p11 }
  0x3d   :  { %435 = vmatprep.mubr.msk.bf16.mxu0 %vm566_vm0, %v565_v0  ;;  %402 = vmatpush3.bf16.msra.mxu1 %v449_v5  ;;  %v364_v36 = vld [vmem:[#allocation7 + $0x2] ss:$0 sm:$0xff] }
  0x3e   :  { %403 = vmatprep.subr.bf16.mxu1 %v565_v0  ;;  %420 = vmatpush3.bf16.msra.mxu0 %v456_v12  ;;  %p540_p0 = pnand %p539_p13, %p533_p10 }
  0x3f   :  { %421 = vmatprep.subr.bf16.mxu0 %v565_v0 }
  0x41   :  { %404 = vmatpush3.bf16.msra.mxu1 %v450_v6 }
  0x42   :  { %405 = vmatprep.subr.bf16.mxu1 %v565_v0  ;;  %422 = vmatpush3.bf16.msra.mxu0 %v457_v13 }
  0x43   :  { %423 = vmatprep.subr.bf16.mxu0 %v565_v0 }
  0x45   :  { %406 = vmatpush3.bf16.msra.mxu1 %v451_v7 }
  0x46   :  { %407 = vmatprep.subr.bf16.mxu1 %v565_v0  ;;  %424 = vmatpush3.bf16.msra.mxu0 %v458_v14 }
  0x47   :  { %425 = vmatprep.subr.bf16.mxu0 %v565_v0 }
  0x49   :  { %408 = vmatpush3.bf16.msra.mxu1 %v452_v8 }
  0x4a   :  { %409 = vmatprep.subr.bf16.mxu1 %v565_v0  ;;  %426 = vmatpush3.bf16.msra.mxu0 %v459_v15 }
  0x4b   :  { %427 = vmatprep.subr.bf16.mxu0 %v565_v0 }
  0x4d   :  { %410 = vmatpush3.bf16.msra.mxu1 %v453_v9 }
  0x4e   :  { %411 = vmatprep.subr.bf16.mxu1 %v565_v0  ;;  %428 = vmatpush3.bf16.msra.mxu0 %v460_v16 }
  0x4f   :  { %429 = vmatprep.subr.bf16.mxu0 %v565_v0 }
  0x51   :  { %412 = vmatpush3.bf16.msra.mxu1 %v454_v10 }
  0x52   :  { %413 = vmatprep.subr.bf16.mxu1 %v565_v0  ;;  %430 = vmatpush3.bf16.msra.mxu0 %v461_v17 }
  0x53   :  { %431 = vmatprep.subr.bf16.mxu0 %v565_v0 }
  0x55   :  { %414 = vmatpush3.bf16.msra.mxu1 %v455_v11 }
  0x56   :  { %432 = vmatpush3.bf16.msra.mxu0 %v462_v26 }
  0x57   :  { %433 = vmatprep.subr.bf16.mxu0 %v565_v0 }
  0x5a   :  { %434 = vmatpush3.bf16.msra.mxu0 %v463_v27 }
 0x10f   :  { %v140_v19 = vpop.f32.mrb[0].mxu0 }
 0x110   :  { %v141_v20 = vadd.f32 %v352_v18, %v140_v19  ;;  %v397_v21 = vpop.f32.mrb[1].mxu0 }
 0x111   :  { %v143_v22 = vpop.f32.mrb[2].mxu0 }
 0x112   :  { %v146_v23 = vmax.f32 %v141_v20, 0.0  ;;  %v398_v24 = vpop.f32.mrb[3].mxu0 }
 0x114   :  { %v147_v25 = vpack.c.bf16 %v146_v23, %v146_v23 }
 0x116   :  { %416 = vmatmul.mubr.bf16.vlgmr.msra.gmra.mrb[0].mxu1 %v147_v25 }
 0x1e9   :  { %v234_v29 = vpop.f32.mrb[0].mxu1 }
 0x1ea   :  { %v235_v30 = vadd.f32 %v355_v28, %v234_v29  ;;  %v417_v31 = vpop.f32.mrb[1].mxu1 }
 0x1eb   :  { %v237_v32 = vpop.f32.mrb[2].mxu1 }
 0x1ec   :  { %v240_v33 = vmax.f32 %v235_v30, 0.0  ;;  %v418_v34 = vpop.f32.mrb[3].mxu1 }
 0x1ee   :  { %v241_v35 = vpack.c.bf16 %v240_v33, %v240_v33 }
 0x1f0   :  { %436 = vmatmul.mubr.bf16.vlgmr.msra.gmra.mrb[4].mxu0 %v241_v35 }
 0x2c3   :  { %v328_v37 = vpop.f32.mrb[4].mxu0 }
 0x2c4   :  { %v329_v38 = vadd.f32 %v364_v36, %v328_v37  ;;  %v437_v39 = vpop.f32.mrb[5].mxu0 }
 0x2c5   :  { %v331_v40 = vpop.f32.mrb[6].mxu0 }
 0x2c6   :  { %464 = vtanh.f32 %v329_v38  ;;  %v438_v41 = vpop.f32.mrb[7].mxu0 }
 0x2d0   :  { %v465_v42 = vpop.eup %464 }
 0x2d1   :  { %335 = vst [vmem:[#allocation8] sm:$0xff] %v465_v42 }
 0x2d2   :  { %543 = shalt.err (!%p540_p0)
}
 0x2d3   :  { %s544_s25 = scalar_lea.hbm %s659_s3, 128 }
 0x2d4   :  { %p545_p1 = scmp.ne.s32.totalorder %s659_s3, %s544_s25  ;;  %p548_p2 = scmp.lt.u32.totalorder %s544_s25, %s659_s3 }
 0x2d6   :  { %p550_p3 = pnand %p548_p2, %p545_p1 }
 0x2d8   :  { %553 = shalt.err (!%p550_p3)
}
 0x2d9   :  { %345 = dma.vmem_to_hbm [thread:$0]  %s343_s21, 128, %s659_s3, [#allocation4]  }
 0x2da   :  { %558 = dma.done.wait [#allocation4], 128  }
 0x2db   :  { %559 = vsyncadd [#allocation4], 4294967168 }
 0x2dc   :  { %349 = vsyncpa [#allocation3], 1 }
 0x2dd   :  { %350 = vsyncpa [#allocation6], 1 }
 0x2de   :  { %351 = vsyncpa [#allocation4], 1 }

</bundles_post_ra>
